<compile_context>
chip_gen: v7x
topology: tpu7x:2x2x1
jax: 0.10.0
libtpu: 0.0.40
codegen_flags: <defaults>
</compile_context>

<pallas_src>
import functools

import jax
import jax.numpy as jnp
from jax.experimental import pallas as pl
from jax.experimental.pallas import tpu as pltpu

_LANE = 128          # TPU lane width
_MAX_BATCH_TILE = 512  # rows per grid step for large batches


def _round_up(n, m):
    return ((n + m - 1) // m) * m


def _actor_kernel(x_ref, w1_ref, b1_ref, w2_ref, b2_ref, o_ref, *, a_num):
    # x_ref:  (TB, s_dim)        VMEM (streamed per grid step)
    # w1_ref: (s_dim, Hpad)      VMEM (resident)
    # b1_ref: (1, Hpad)          VMEM (resident)
    # w2_ref: (Hpad, Apad)       VMEM (resident)
    # b2_ref: (1, Apad)          VMEM (resident)
    # o_ref:  (TB, Apad)         VMEM (lane-dense output tile)
    x = x_ref[...].astype(jnp.float32)

    # Layer 1: Linear + ReLU (MXU matmul, f32 accumulation, VPU bias/ReLU).
    h = jnp.dot(x, w1_ref[...], preferred_element_type=jnp.float32) + b1_ref[...]
    h = jnp.maximum(h, 0.0)

    # Layer 2: Linear -> logits over the padded action lanes.
    logits = jnp.dot(h, w2_ref[...], preferred_element_type=jnp.float32) + b2_ref[...]

    # Mask the padded action lanes so the softmax matches an a_num-wide softmax.
    lane = jax.lax.broadcasted_iota(jnp.int32, logits.shape, dimension=1)
    logits = jnp.where(lane < a_num, logits, jnp.finfo(jnp.float32).min)

    # Numerically-stable softmax along the lane axis (XLU reduce + EUP exp).
    m = jnp.max(logits, axis=-1, keepdims=True)
    e = jnp.exp(logits - m)
    denom = jnp.sum(e, axis=-1, keepdims=True)
    o_ref[...] = (e / denom).astype(o_ref.dtype)


def init_actor_params(key, s_dim, hidden, a_num, dtype=jnp.float32):
    """nn.Linear-style uniform(-1/sqrt(fan_in), +) init, weights pre-transposed."""
    k1, k2, k3, k4 = jax.random.split(key, 4)
    lim1 = 1.0 / jnp.sqrt(jnp.asarray(s_dim, dtype))
    lim2 = 1.0 / jnp.sqrt(jnp.asarray(hidden, dtype))
    w1 = jax.random.uniform(k1, (s_dim, hidden), dtype, -lim1, lim1)
    b1 = jax.random.uniform(k2, (hidden,), dtype, -lim1, lim1)
    w2 = jax.random.uniform(k3, (hidden, a_num), dtype, -lim2, lim2)
    b2 = jax.random.uniform(k4, (a_num,), dtype, -lim2, lim2)
    return w1, b1, w2, b2


def prepare_actor_params(w1, b1, w2, b2):
    """Zero-pad hidden and action dims to lane multiples (done once, off hot path)."""
    s_dim, hidden = w1.shape
    a_num = w2.shape[1]
    hp = _round_up(hidden, _LANE)
    ap = _round_up(a_num, _LANE)
    w1p = jnp.zeros((s_dim, hp), w1.dtype).at[:, :hidden].set(w1)
    b1p = jnp.zeros((1, hp), b1.dtype).at[0, :hidden].set(b1.reshape(-1))
    w2p = jnp.zeros((hp, ap), w2.dtype).at[:hidden, :a_num].set(w2)
    b2p = jnp.zeros((1, ap), b2.dtype).at[0, :a_num].set(b2.reshape(-1))
    return w1p, b1p, w2p, b2p


@functools.partial(jax.jit, static_argnames=("a_num",))
def actor_forward(s, w1p, b1p, w2p, b2p, *, a_num):
    """Fused Actor forward: softmax(relu(s @ W1 + b1) @ W2 + b2) -> (B, a_num)."""
    B, s_dim = s.shape
    hp = w1p.shape[1]
    ap = w2p.shape[1]

    # Batch tile: full batch when small (block == array dim is always legal),
    # otherwise a multiple-of-8 tile that keeps the pipeline fed.
    tb = B if B <= _MAX_BATCH_TILE else _MAX_BATCH_TILE
    grid = (pl.cdiv(B, tb),)

    cost = pl.CostEstimate(
        flops=2 * B * s_dim * hp + 2 * B * hp * ap,
        transcendentals=B * ap,
        bytes_accessed=4 * (s.size + w1p.size + b1p.size + w2p.size + b2p.size + B * ap),
    )

    out = pl.pallas_call(
        functools.partial(_actor_kernel, a_num=a_num),
        out_shape=jax.ShapeDtypeStruct((B, ap), jnp.float32),
        grid=grid,
        in_specs=[
            pl.BlockSpec((tb, s_dim), lambda i: (i, 0)),   # streamed activations
            pl.BlockSpec((s_dim, hp), lambda i: (0, 0)),   # resident weights
            pl.BlockSpec((1, hp), lambda i: (0, 0)),
            pl.BlockSpec((hp, ap), lambda i: (0, 0)),
            pl.BlockSpec((1, ap), lambda i: (0, 0)),
        ],
        out_specs=pl.BlockSpec((tb, ap), lambda i: (i, 0)),
        compiler_params=pltpu.CompilerParams(
            dimension_semantics=("parallel",),  # shard batch tiles across cores (v7x)
        ),
        cost_estimate=cost,
    )(s, w1p, b1p, w2p, b2p)

    # Drop the padded action lanes.
    return out[:, :a_num]


if __name__ == "__main__":
    B, S_DIM, HIDDEN, A_NUM = 8, 16, 32, 4

    key = jax.random.PRNGKey(0)
    k_x, k_p = jax.random.split(key)
    s = jax.random.normal(k_x, (B, S_DIM), jnp.float32)

    w1, b1, w2, b2 = init_actor_params(k_p, S_DIM, HIDDEN, A_NUM)
    w1p, b1p, w2p, b2p = prepare_actor_params(w1, b1, w2, b2)

    out = actor_forward(s, w1p, b1p, w2p, b2p, a_num=A_NUM)
    out = jax.block_until_ready(out)

    # Reference in plain JAX (same math as the PyTorch module).
    ref = jax.nn.softmax(jnp.maximum(s @ w1 + b1, 0.0) @ w2 + b2, axis=-1)
    assert out.shape == (B, A_NUM), out.shape
    assert jnp.allclose(out, ref, atol=1e-5, rtol=1e-5), "mismatch vs reference"
    assert jnp.allclose(jnp.sum(out, axis=-1), 1.0, atol=1e-5), "rows must sum to 1"

    print("KERNEL_OK")
</pallas_src>

<mosaic_0001>
module attributes {stable_mosaic.version = 11 : i64} {
  func.func @_actor_kernel(%arg0: i32, %arg1: memref<8x16xf32, #tpu.memory_space<vmem>>, %arg2: memref<16x128xf32, #tpu.memory_space<vmem>>, %arg3: memref<1x128xf32, #tpu.memory_space<vmem>>, %arg4: memref<128x128xf32, #tpu.memory_space<vmem>>, %arg5: memref<1x128xf32, #tpu.memory_space<vmem>>, %arg6: memref<8x128xf32, #tpu.memory_space<vmem>>) attributes {dimension_semantics = [#tpu.dimension_semantics<parallel>], iteration_bounds = array<i64: 1>, scalar_prefetch = 0 : i64, scratch_operands = 0 : i64, tpu.core_type = #tpu.core_type<tc>, window_params = [{transform_indices = @transform_0, window_bounds = array<i64: 8, 16>}, {pipeline_mode = #tpu.pipeline_mode<synchronous>, transform_indices = @transform_1, window_bounds = array<i64: 16, 128>}, {pipeline_mode = #tpu.pipeline_mode<synchronous>, transform_indices = @transform_2, window_bounds = array<i64: 1, 128>}, {pipeline_mode = #tpu.pipeline_mode<synchronous>, transform_indices = @transform_3, window_bounds = array<i64: 128, 128>}, {pipeline_mode = #tpu.pipeline_mode<synchronous>, transform_indices = @transform_4, window_bounds = array<i64: 1, 128>}, {transform_indices = @transform_5, window_bounds = array<i64: 8, 128>}]} {
    %c0 = arith.constant 0 : index
    %c0_0 = arith.constant 0 : index
    %0 = vector.load %arg1[%c0, %c0_0] : memref<8x16xf32, #tpu.memory_space<vmem>>, vector<8x16xf32>
    %c0_1 = arith.constant 0 : index
    %c0_2 = arith.constant 0 : index
    %1 = vector.load %arg2[%c0_1, %c0_2] : memref<16x128xf32, #tpu.memory_space<vmem>>, vector<16x128xf32>
    %cst = arith.constant dense<0.000000e+00> : vector<8x128xf32>
    %2 = tpu.matmul %0, %1, %cst {dimension_numbers = #tpu.dot_dimension_numbers<[1], [0], [0], [1], [0, 0, 1, 1], [], []>} : vector<8x16xf32>, vector<16x128xf32>, vector<8x128xf32> -> vector<8x128xf32>
    %c0_3 = arith.constant 0 : index
    %c0_4 = arith.constant 0 : index
    %3 = vector.load %arg3[%c0_3, %c0_4] : memref<1x128xf32, #tpu.memory_space<vmem>>, vector<1x128xf32>
    %4 = vector.broadcast %3 : vector<1x128xf32> to vector<8x128xf32>
    %5 = arith.addf %2, %4 : vector<8x128xf32>
    %cst_5 = arith.constant 0.000000e+00 : f32
    %6 = vector.broadcast %cst_5 : f32 to vector<8x128xf32>
    %7 = arith.maximumf %5, %6 : vector<8x128xf32>
    %c0_6 = arith.constant 0 : index
    %c0_7 = arith.constant 0 : index
    %8 = vector.load %arg4[%c0_6, %c0_7] : memref<128x128xf32, #tpu.memory_space<vmem>>, vector<128x128xf32>
    %cst_8 = arith.constant dense<0.000000e+00> : vector<8x128xf32>
    %9 = tpu.matmul %7, %8, %cst_8 {dimension_numbers = #tpu.dot_dimension_numbers<[1], [0], [0], [1], [0, 0, 1, 1], [], []>} : vector<8x128xf32>, vector<128x128xf32>, vector<8x128xf32> -> vector<8x128xf32>
    %c0_9 = arith.constant 0 : index
    %c0_10 = arith.constant 0 : index
    %10 = vector.load %arg5[%c0_9, %c0_10] : memref<1x128xf32, #tpu.memory_space<vmem>>, vector<1x128xf32>
    %11 = vector.broadcast %10 : vector<1x128xf32> to vector<8x128xf32>
    %12 = arith.addf %9, %11 : vector<8x128xf32>
    %13 = tpu.iota {dimensions = array<i32: 1>} : vector<8x128xi32>
    %c4_i32 = arith.constant 4 : i32
    %14 = vector.broadcast %c4_i32 : i32 to vector<8x128xi32>
    %15 = arith.cmpi slt, %13, %14 : vector<8x128xi32>
    %cst_11 = arith.constant -3.40282347E+38 : f32
    %16 = vector.broadcast %cst_11 : f32 to vector<8x128xf32>
    %17 = arith.select %15, %12, %16 : vector<8x128xi1>, vector<8x128xf32>
    %cst_12 = arith.constant dense<0xFF800000> : vector<8xf32>
    %18 = vector.multi_reduction <maximumf>, %17, %cst_12 [1] : vector<8x128xf32> to vector<8xf32>
    %19 = vector.shape_cast %18 : vector<8xf32> to vector<8x1xf32>
    %20 = vector.broadcast %19 : vector<8x1xf32> to vector<8x128xf32>
    %21 = arith.subf %17, %20 : vector<8x128xf32>
    %22 = math.exp %21 : vector<8x128xf32>
    %cst_13 = arith.constant dense<0.000000e+00> : vector<8xf32>
    %23 = vector.multi_reduction <add>, %22, %cst_13 [1] : vector<8x128xf32> to vector<8xf32>
    %24 = vector.shape_cast %23 : vector<8xf32> to vector<8x1xf32>
    %25 = vector.broadcast %24 : vector<8x1xf32> to vector<8x128xf32>
    %26 = arith.divf %22, %25 : vector<8x128xf32>
    %c0_14 = arith.constant 0 : index
    %c0_15 = arith.constant 0 : index
    %27 = vector.load %arg6[%c0_14, %c0_15] : memref<8x128xf32, #tpu.memory_space<vmem>>, vector<8x128xf32>
    tpu.vector_store %arg6[%c0_14, %c0_15], %26 {strides = array<i32>} : memref<8x128xf32, #tpu.memory_space<vmem>>, vector<8x128xf32>,
    return
  }
  func.func @transform_0(%arg0: i32) -> (i32, i32) {
    %c0_i32 = arith.constant 0 : i32
    %c0_i32_0 = arith.constant 0 : i32
    return %arg0, %c0_i32 : i32, i32
  }
  func.func @transform_1(%arg0: i32) -> (i32, i32) {
    %c0_i32 = arith.constant 0 : i32
    %c0_i32_0 = arith.constant 0 : i32
    %c0_i32_1 = arith.constant 0 : i32
    return %c0_i32, %c0_i32_0 : i32, i32
  }
  func.func @transform_2(%arg0: i32) -> (i32, i32) {
    %c0_i32 = arith.constant 0 : i32
    %c0_i32_0 = arith.constant 0 : i32
    %c0_i32_1 = arith.constant 0 : i32
    return %c0_i32, %c0_i32_0 : i32, i32
  }
  func.func @transform_3(%arg0: i32) -> (i32, i32) {
    %c0_i32 = arith.constant 0 : i32
    %c0_i32_0 = arith.constant 0 : i32
    %c0_i32_1 = arith.constant 0 : i32
    return %c0_i32, %c0_i32_0 : i32, i32
  }
  func.func @transform_4(%arg0: i32) -> (i32, i32) {
    %c0_i32 = arith.constant 0 : i32
    %c0_i32_0 = arith.constant 0 : i32
    %c0_i32_1 = arith.constant 0 : i32
    return %c0_i32, %c0_i32_0 : i32, i32
  }
  func.func @transform_5(%arg0: i32) -> (i32, i32) {
    %c0_i32 = arith.constant 0 : i32
    %c0_i32_0 = arith.constant 0 : i32
    return %arg0, %c0_i32 : i32, i32
  }
}

</mosaic_0001>

<bundles_post_ra>
// kernel: actor_forward.1
= control target key start
LH: loop header
LB: loop body
LE: loop exit
PB: predicated region body
PF: predicated region fallthrough
CT: control target
= control target key end

     0   :  { %10 = vsyncpa [#allocation3], 0  ;;  %s520_s0 = inlined_call_operand.hbm [shape: f32[8,16], index: 0, kind: input, shape index: {}]   ;;  %s521_s1 = inlined_call_operand.hbm [shape: f32[16,128], index: 1, kind: input, shape index: {}]   ;;  %s522_s2 = inlined_call_operand.vmem [shape: f32[1,128], index: 2, kind: input, shape index: {}]   ;;  %s523_s3 = inlined_call_operand.hbm [shape: f32[128,128], index: 3, kind: input, shape index: {}]   ;;  %s524_s4 = inlined_call_operand.vmem [shape: f32[1,128], index: 4, kind: input, shape index: {}]   ;;  %s525_s5 = inlined_call_operand.vmem [shape: f32[8,128], index: 5, kind: output, shape index: {}]  }
   0x1   :  { %11 = vsyncpa [#allocation5], 0  ;;  %s431_s18 = smov [#allocation4]   ;;  %s361_s22 = scalar_lea.hbm %s521_s1, 256 }
   0x2   :  { %s27_s19 = sshll.u32 %s431_s18, 4  ;;  %p362_p0 = scmp.ne.s32.totalorder %s521_s1, %s361_s22  ;;  %s28_s19 = int_to_ptr.vmem [resolvable:$true] %s27_s19 }
   0x3   :  { %p365_p1 = scmp.lt.u32.totalorder %s361_s22, %s521_s1 }
   0x5   :  { %p367_p2 = pnand %p365_p1, %p362_p0 }
   0x7   :  { %370 = shalt.err (!%p367_p2)
}
   0x8   :  { %s371_s27 = scalar_lea.vmem %s28_s19, 256  ;;  %p376_p4 = scmp.lt.s32.totalorder %s28_s19, %s28_s19 }
   0x9   :  { %p372_p3 = scmp.ne.s32.totalorder %s28_s19, %s371_s27  ;;  %p377_p5 = scmp.lt.s32.totalorder %s371_s27, %s371_s27 }
   0xb   :  { %p378_p6 = por %p377_p5, %p376_p4 }
   0xd   :  { %p379_p7 = pnand %p378_p6, %p372_p3 }
   0xf   :  { %382 = shalt.err (!%p379_p7)
}
  0x10   :  { %s432_s28 = smov 128   ;;  %s433_s29 = smov 8  }
  0x11   :  { %33 = dma.hbm_to_vmem [thread:$0]  %s521_s1, 256, %s28_s19, [#allocation5], %s432_s28, %s432_s28, %s433_s29  }
  0x12   :  { %s434_s7 = smov [#allocation2]   ;;  %s435_s9 = smov [#allocation6]  }
  0x13   :  { %s18_s8 = sshll.u32 %s434_s7, 4  ;;  %s41_s10 = sshll.u32 %s435_s9, 4  ;;  %s19_s8 = int_to_ptr.vmem [resolvable:$true] %s18_s8  ;;  %s42_s10 = int_to_ptr.vmem [resolvable:$true] %s41_s10 }
  0x14   :  { %s383_s13 = scalar_lea.hbm %s520_s0, 128 }
  0x15   :  { %p384_p8 = scmp.ne.s32.totalorder %s520_s0, %s383_s13  ;;  %p387_p9 = scmp.lt.u32.totalorder %s383_s13, %s520_s0 }
  0x17   :  { %p389_p10 = pnand %p387_p9, %p384_p8 }
  0x19   :  { %392 = shalt.err (!%p389_p10)
}
  0x1a   :  { %s393_s1 = scalar_lea.vmem %s19_s8, 128  ;;  %p398_p12 = scmp.lt.s32.totalorder %s19_s8, %s19_s8 }
  0x1b   :  { %p394_p11 = scmp.ne.s32.totalorder %s19_s8, %s393_s1  ;;  %p399_p13 = scmp.lt.s32.totalorder %s393_s1, %s393_s1 }
  0x1d   :  { %p400_p0 = por %p399_p13, %p398_p12 }
  0x1f   :  { %p401_p1 = pnand %p400_p0, %p394_p11 }
  0x21   :  { %404 = shalt.err (!%p401_p1)
}
  0x22   :  { %21 = dma.hbm_to_vmem [thread:$0]  %s520_s0, 128, %s19_s8, [#allocation3]  }
  0x23   :  { %s405_s22 = scalar_lea.hbm %s523_s3, 2048 }
  0x24   :  { %p406_p2 = scmp.ne.s32.totalorder %s523_s3, %s405_s22  ;;  %p409_p3 = scmp.lt.u32.totalorder %s405_s22, %s523_s3 }
  0x26   :  { %p411_p4 = pnand %p409_p3, %p406_p2 }
  0x28   :  { %414 = shalt.err (!%p411_p4)
}
  0x29   :  { %s415_s27 = scalar_lea.vmem %s42_s10, 2048  ;;  %p420_p6 = scmp.lt.s32.totalorder %s42_s10, %s42_s10 }
  0x2a   :  { %p416_p5 = scmp.ne.s32.totalorder %s42_s10, %s415_s27  ;;  %p421_p7 = scmp.lt.s32.totalorder %s415_s27, %s415_s27 }
  0x2c   :  { %p422_p8 = por %p421_p7, %p420_p6 }
  0x2e   :  { %p423_p9 = pnand %p422_p8, %p416_p5 }
  0x30   :  { %426 = shalt.err (!%p423_p9)
}
  0x31   :  { %47 = dma.hbm_to_vmem [thread:$0]  %s523_s3, 2048, %s42_s10, [#allocation5], %s432_s28, %s432_s28, %s433_s29  }
  0x32   :  { %427 = dma.done.wait [#allocation3], 128  }
  0x33   :  { %428 = vsyncadd [#allocation3], 4294967168 }
  0x34   :  { %429 = dma.done.wait [#allocation5], 2304  }
  0x35   :  { %430 = vsyncadd [#allocation5], 4294964992  ;;  %v436_v0 = vmov 0.0|0.0   ;;  %vm437_vm0 = vmmov 0   ;;  %v438_v1 = vmov 0.0   ;;  %v60_v2 = vld [vmem:[#allocation4] sm:$0xff]  ;;  %v237_v35 = vlaneseq }
  0x36   :  { %322 = vmatprep.subr.bf16.mxu0 %v436_v0  ;;  %284 = vmatprep.mubr.msk.f32.mxu0 %vm437_vm0, %v438_v1  ;;  %v61_v3 = vld [vmem:[#allocation4 + $0x8] sm:$0xff]  ;;  %v144_v5 = vld [vmem:[#allocation6] sm:$0xff]  ;;  %v145_v6 = vld [vmem:[#allocation6 + $0x8] sm:$0xff]  ;;  %vm69_vm1 = vcmask 130048  }
  0x37   :  { %325 = vmatprep.subr.bf16.mxu1 %v436_v0  ;;  %319 = vmatprep.mubr.msk.f32.mxu1 %vm437_vm0, %v438_v1  ;;  %v323_v4 = vpack.c.bf16 %v61_v3, %v60_v2  ;;  %v146_v7 = vld [vmem:[#allocation6 + $0x10] sm:$0xff]  ;;  %v326_v8 = vpack.c.bf16 %v145_v6, %v144_v5  ;;  %v147_v9 = vld [vmem:[#allocation6 + $0x18] sm:$0xff]  ;;  %v59_v10 = vld [vmem:[#allocation2] sm:$0xff]  ;;  %v238_v36 = vand.u32 127, %v237_v35 }
  0x38   :  { %v329_v11 = vpack.c.bf16 %v147_v9, %v146_v7  ;;  %v148_v12 = vld [vmem:[#allocation6 + $0x20] sm:$0xff]  ;;  %v149_v13 = vld [vmem:[#allocation6 + $0x28] sm:$0xff]  ;;  %v150_v15 = vld [vmem:[#allocation6 + $0x30] sm:$0xff] }
  0x39   :  { %324 = vmatpush3.bf16.msra.mxu0 %v323_v4  ;;  %327 = vmatpush3.bf16.msra.mxu1 %v326_v8  ;;  %v332_v14 = vpack.c.bf16 %v149_v13, %v148_v12  ;;  %v151_v16 = vld [vmem:[#allocation6 + $0x38] sm:$0xff]  ;;  %v152_v18 = vld [vmem:[#allocation6 + $0x40] sm:$0xff]  ;;  %v153_v19 = vld [vmem:[#allocation6 + $0x48] sm:$0xff]  ;;  %vm239_vm2 = vcmp.lt.s32.totalorder %v238_v36, 4 }
  0x3a   :  { %328 = vmatprep.subr.bf16.mxu1 %v436_v0  ;;  %v335_v17 = vpack.c.bf16 %v151_v16, %v150_v15  ;;  %v338_v20 = vpack.c.bf16 %v153_v19, %v152_v18  ;;  %v154_v21 = vld [vmem:[#allocation6 + $0x50] sm:$0xff]  ;;  %v155_v22 = vld [vmem:[#allocation6 + $0x58] sm:$0xff]  ;;  %v156_v24 = vld [vmem:[#allocation6 + $0x60] sm:$0xff] }
  0x3b   :  { %v341_v23 = vpack.c.bf16 %v155_v22, %v154_v21  ;;  %v157_v25 = vld [vmem:[#allocation6 + $0x68] sm:$0xff]  ;;  %v158_v27 = vld [vmem:[#allocation6 + $0x70] sm:$0xff]  ;;  %v159_v28 = vld [vmem:[#allocation6 + $0x78] sm:$0xff] }
  0x3c   :  { %285 = vmatmul.mubr.msk.f32.vlgmr.msra.gmra.mrb[0].mxu0 %vm69_vm1, %v59_v10  ;;  %v344_v26 = vpack.c.bf16 %v157_v25, %v156_v24  ;;  %v347_v29 = vpack.c.bf16 %v159_v28, %v158_v27  ;;  %v257_v30 = vld [vmem:[%s522_s2] ss:$0 sm:$0xff] }
  0x3d   :  { %330 = vmatpush3.bf16.msra.mxu1 %v329_v11  ;;  %v259_v37 = vld [vmem:[%s524_s4] ss:$0 sm:$0xff] }
  0x3e   :  { %331 = vmatprep.subr.bf16.mxu1 %v436_v0 }
  0x41   :  { %333 = vmatpush3.bf16.msra.mxu1 %v332_v14 }
  0x42   :  { %334 = vmatprep.subr.bf16.mxu1 %v436_v0 }
  0x45   :  { %336 = vmatpush3.bf16.msra.mxu1 %v335_v17 }
  0x46   :  { %337 = vmatprep.subr.bf16.mxu1 %v436_v0 }
  0x49   :  { %339 = vmatpush3.bf16.msra.mxu1 %v338_v20 }
  0x4a   :  { %340 = vmatprep.subr.bf16.mxu1 %v436_v0 }
  0x4d   :  { %342 = vmatpush3.bf16.msra.mxu1 %v341_v23 }
  0x4e   :  { %343 = vmatprep.subr.bf16.mxu1 %v436_v0 }
  0x51   :  { %345 = vmatpush3.bf16.msra.mxu1 %v344_v26 }
  0x52   :  { %346 = vmatprep.subr.bf16.mxu1 %v436_v0 }
  0x55   :  { %348 = vmatpush3.bf16.msra.mxu1 %v347_v29 }
 0x10f   :  { %v139_v31 = vpop.f32.mrb[0].mxu0 }
 0x110   :  { %v140_v32 = vadd.f32 %v257_v30, %v139_v31  ;;  %v286_v33 = vpop.f32.mrb[1].mxu0 }
 0x112   :  { %v143_v34 = vmax.f32 %v140_v32, 0.0 }
 0x114   :  { %320 = vmatmul.mubr.f32.vlgmr.msra.gmra.mrb[0].mxu1 %v143_v34 }
 0x1e7   :  { %v233_v38 = vpop.f32.mrb[0].mxu1 }
 0x1e8   :  { %v234_v39 = vadd.f32 %v259_v37, %v233_v38  ;;  %v321_v40 = vpop.f32.mrb[1].mxu1 }
 0x1ea   :  { %v240_v41 = vsel %vm239_vm2, %v234_v39, -3.4028235e+38 }
 0x1eb   :  { %241 = vmax.xlane.f32.xlu0 %v240_v41 }
 0x278   :  { %v242_v42 = vpop.xlane.xlu0 %241 }
 0x279   :  { %v243_v43 = vsub.f32 %v240_v41, %v242_v42 }
 0x27b   :  { %v244_v44 = vmul.f32 1.442695, %v243_v43 }
 0x27d   :  { %357 = vpow2.f32 %v244_v44 }
 0x287   :  { %v358_v45 = vpop.eup %357 }
 0x288   :  { %246 = vadd.xlane.f32.xlu0 %v358_v45 }
 0x315   :  { %v247_v46 = vpop.xlane.xlu0 %246 }
 0x316   :  { %359 = vrcp.f32 %v247_v46 }
 0x320   :  { %v360_v47 = vpop.eup %359 }
 0x321   :  { %v249_v48 = vmul.f32 %v360_v47, %v358_v45 }
 0x323   :  { %250 = vst [vmem:[%s525_s5] sm:$0xff] %v249_v48 }
 0x324   :  { %255 = vsyncpa [#allocation3], 1 }
 0x325   :  { %256 = vsyncpa [#allocation5], 1 }

</bundles_post_ra>
